<compile_context>
chip_gen: v5e
topology: v5e:2x2
jax: 0.10.0
libtpu: 0.0.40
codegen_flags: <defaults>
</compile_context>

<pallas_src>
import functools

import jax
import jax.numpy as jnp
from jax import lax
from jax.experimental import pallas as pl
from jax.experimental.pallas import tpu as pltpu


# ----------------------------- Pallas kernel ---------------------------------
def _router_loss_kernel(tri_ref, x_ref, out_ref,
                        carry_ref, psum_ref, msum_ref, zsum_ref, *,
                        num_experts, tokens_per_group, padded_tokens, token_tile,
                        chunk, expert_capacity):
    t = pl.program_id(1)
    nt = pl.num_programs(1)
    E = num_experts
    TT = token_tile
    C = chunk
    needs_mask = padded_tokens != tokens_per_group       # static python bool

    @pl.when(t == 0)
    def _init():
        carry_ref[...] = jnp.zeros_like(carry_ref)
        psum_ref[...] = jnp.zeros_like(psum_ref)
        msum_ref[...] = jnp.zeros_like(msum_ref)
        zsum_ref[...] = jnp.zeros_like(zsum_ref)

    # ---- in-kernel transpose (TT, E) -> (E, TT) on the MXU (identity-matmul) ----
    # The block is the contiguous untransposed (1, TT, E) HBM slab.  f32 inputs are split
    # into three exact bf16 pieces (1.0 * bf16 accumulated in f32 is exact), so the
    # reconstructed transposed logits match f32 to ~2^-25 relative.
    xr = x_ref[0]                                         # (TT, E) in the input dtype
    ident = (lax.broadcasted_iota(jnp.int32, (E, E), 0) ==
             lax.broadcasted_iota(jnp.int32, (E, E), 1)).astype(jnp.bfloat16)
    dn = (((1,), (1,)), ((), ()))                         # contract both expert axes -> (E, TT)

    def _tpose(piece):
        return lax.dot_general(ident, piece, dn, preferred_element_type=jnp.float32)

    if xr.dtype == jnp.bfloat16:
        x = _tpose(xr)
    else:
        xf = xr.astype(jnp.float32)
        p1 = xf.astype(jnp.bfloat16)
        r1 = xf - p1.astype(jnp.float32)                  # exact remainder
        p2 = r1.astype(jnp.bfloat16)
        r2 = r1 - p2.astype(jnp.float32)                  # exact remainder
        p3 = r2.astype(jnp.bfloat16)
        x = (_tpose(p1) + _tpose(p2)) + _tpose(p3)        # (E, TT) f32

    if needs_mask:
        lane = lax.broadcasted_iota(jnp.int32, (1, TT), 1)
        valid = ((t * TT + lane) < tokens_per_group).astype(jnp.float32)   # (1, TT)
    else:
        valid = None

    # ---- z loss: logsumexp over experts (8-sublane reduction, lane-dense) -------
    m = jnp.max(x, axis=0, keepdims=True)                 # (1, TT)
    ex = jnp.exp(x - m)                                    # (E, TT)   EUP
    sum_ex = jnp.sum(ex, axis=0, keepdims=True)            # (1, TT)
    log_z = m + jnp.log(sum_ex)                             # (1, TT)
    lz2 = log_z * log_z
    if valid is not None:
        lz2 = lz2 * valid
    zsum_ref[...] = zsum_ref[...] + jnp.sum(lz2, keepdims=True)

    # ---- softmax probs: one (1, TT) divide, applied as a multiply ---------------
    # (exact divide kept; pl.reciprocal(approx=True) was flagged as a tolerance risk)
    inv = 1.0 / sum_ex
    probs = ex * inv                                        # (E, TT)
    p_part = probs * valid if valid is not None else probs
    psum_ref[...] = psum_ref[...] + jnp.sum(p_part, axis=1, keepdims=True)   # (E, 1)

    # ---- expert selection from raw logits (argmax is softmax-invariant) ---------
    subf = lax.broadcasted_iota(jnp.int32, (E, TT), 0).astype(jnp.float32)   # expert ids
    idx = jnp.min(jnp.where(x == m, subf, float(E)), axis=0, keepdims=True)  # first max
    onehot = (subf == idx).astype(jnp.float32)              # (E, TT)
    if valid is not None:
        onehot = onehot * valid     # padded tokens route nowhere / consume no capacity

    # ---- capacity: chunked cumulative count (small (C,C) tri) + running carry ----
    tri = tri_ref[...]                                       # (C, C) bf16 upper-triangular
    carry = carry_ref[...]                                   # (E, 1) counts from prior tiles
    msum_add = jnp.zeros((E, 1), jnp.float32)
    for j in range(TT // C):                                 # static; TT % C == 0 by construction
        oh_j = onehot[:, j * C:(j + 1) * C]                  # (E, C)
        sub_j = subf[:, j * C:(j + 1) * C]                   # (E, C)
        # 0/1 operands: bf16 matmul with f32 accumulation is exact integer counting
        pref_j = jnp.dot(oh_j.astype(jnp.bfloat16), tri,
                         preferred_element_type=jnp.float32)     # in-chunk inclusive cumcount
        prio_j = pref_j + carry
        kept_j = oh_j * (prio_j <= float(expert_capacity)).astype(jnp.float32)
        # re-derived index; an all-dropped column -> 0 (matches torch argmax of zeros)
        idx2_j = jnp.sum(sub_j * kept_j, axis=0, keepdims=True)  # (1, C)
        mask_j = (sub_j == idx2_j).astype(jnp.float32)            # (E, C)
        if valid is not None:
            mask_j = mask_j * valid[:, j * C:(j + 1) * C]
        msum_add = msum_add + jnp.sum(mask_j, axis=1, keepdims=True)
        carry = carry + jnp.sum(oh_j, axis=1, keepdims=True)
    carry_ref[...] = carry
    msum_ref[...] = msum_ref[...] + msum_add

    @pl.when(t == nt - 1)
    def _finalize():
        z_g = zsum_ref[...]                                               # (1, 1)
        aux_g = jnp.sum(msum_ref[...] * psum_ref[...], keepdims=True)     # (1, 1)
        lane = lax.broadcasted_iota(jnp.int32, (1, 128), 1)
        out_ref[0] = jnp.where(
            lane == 0, jnp.broadcast_to(z_g, (1, 128)),
            jnp.where(lane == 1, jnp.broadcast_to(aux_g, (1, 128)),
                      jnp.zeros((1, 128), jnp.float32)))


# ------------------------------- wrapper --------------------------------------
def switch_router_loss(router_outputs, attention_mask=None, *, num_experts,
                       expert_capacity, router_z_loss_coef, router_aux_loss_coef,
                       token_tile=4096, prefix_chunk=256):
    """Mirror of SwitchRouterLoss.forward. attention_mask is unused (as in torch)."""
    del attention_mask
    # _switch_unpack_router_logits: keep >1-D logits, concat along the token dim.
    logits_list = [r for r in router_outputs if r.ndim > 1]
    router_logits = jnp.concatenate(logits_list, axis=1)      # (G, T, E), original dtype
    G, T, E = router_logits.shape
    assert E == num_experts

    # ---- token tile (TT) / in-tile prefix chunk (C) selection --------------------
    C = min(prefix_chunk, token_tile)
    if T <= C:
        C = TT = T
        NT = 1
    else:
        assert C % 128 == 0, "prefix_chunk must be a multiple of 128 when chunking"
        if T <= token_tile:
            TT = pl.cdiv(T, C) * C
            NT = 1
        else:
            assert token_tile % C == 0, "token_tile must be a multiple of prefix_chunk"
            TT = token_tile
            NT = pl.cdiv(T, TT)
    T_pad = NT * TT

    x = router_logits                                         # no wrapper transpose / cast
    if T_pad != T:
        x = jnp.pad(x, ((0, 0), (0, T_pad - T), (0, 0)))

    # Upper-triangular (incl. diagonal) prefix matrix, built ONCE on the host and passed
    # with a constant index_map (bf16: exact for 0/1 counting, half the VMEM of f32).
    tri = (jnp.arange(C)[:, None] <= jnp.arange(C)[None, :]).astype(jnp.bfloat16)

    kernel = functools.partial(
        _router_loss_kernel,
        num_experts=E, tokens_per_group=T, padded_tokens=T_pad,
        token_tile=TT, chunk=C, expert_capacity=expert_capacity)

    # Note: the token-tile axis must stay the inner sequential ("arbitrary") axis because
    # the capacity cumsum carry crosses token tiles; only the group axis is parallel.
    part = pl.pallas_call(
        kernel,
        out_shape=jax.ShapeDtypeStruct((G, 1, 128), jnp.float32),
        grid_spec=pltpu.PrefetchScalarGridSpec(
            num_scalar_prefetch=0,
            grid=(G, NT),
            in_specs=[
                pl.BlockSpec((C, C), lambda g, t: (0, 0)),            # constant tri block
                pl.BlockSpec((1, TT, E), lambda g, t: (g, t, 0)),     # untransposed logits
            ],
            out_specs=pl.BlockSpec((1, 1, 128), lambda g, t: (g, 0, 0)),
            scratch_shapes=[
                pltpu.VMEM((E, 1), jnp.float32),   # running per-expert routed counts
                pltpu.VMEM((E, 1), jnp.float32),   # sum of probs per expert
                pltpu.VMEM((E, 1), jnp.float32),   # sum of expert_mask per expert
                pltpu.VMEM((1, 1), jnp.float32),   # sum of log_z^2
            ]),
        compiler_params=pltpu.CompilerParams(
            dimension_semantics=("parallel", "arbitrary"),
            vmem_limit_bytes=32 * 1024 * 1024),
    )(tri, x)

    # Per-group partials -> final scalars in XLA (keeps the group axis "parallel").
    z_sums = part[:, 0, 0]      # (G,)  sum_t log_z^2 per group
    aux_sums = part[:, 0, 1]    # (G,)  sum_e (sum_t mask) * (sum_t prob) per group
    z_loss = jnp.sum(z_sums) / (G * T)
    aux_loss = (num_experts / (G * T * T)) * jnp.sum(aux_sums)
    return router_z_loss_coef * z_loss + router_aux_loss_coef * aux_loss


# --------------------------- pure-JAX reference --------------------------------
def _reference_loss(logits, num_experts, expert_capacity, z_coef, aux_coef):
    G, T, E = logits.shape
    logits = logits.astype(jnp.float32)
    log_z = jax.scipy.special.logsumexp(logits, axis=-1)
    z_loss = jnp.sum(log_z ** 2) / (G * T)
    probs = jax.nn.softmax(logits, axis=-1)
    idx = jnp.argmax(probs, axis=-1)
    oh = jax.nn.one_hot(idx, E, dtype=jnp.int32)
    prio = jnp.cumsum(oh, axis=-2)
    oh = oh * (prio <= expert_capacity)
    idx2 = jnp.argmax(oh, axis=-1)
    mask = jax.nn.one_hot(idx2, E, dtype=jnp.float32)
    tokens_per = jnp.mean(mask, axis=-2)
    prob_per = jnp.mean(probs, axis=-2)
    aux = jnp.mean(tokens_per * prob_per) * E ** 2
    return z_coef * z_loss + aux_coef * aux


# --------------------------------- main -----------------------------------------
if __name__ == "__main__":
    # "MixConfig" parameters (deterministic, in-script)
    NUM_EXPERTS = 8
    Z_LOSS_COEF = 1e-3
    AUX_LOSS_COEF = 1e-3

    key = jax.random.PRNGKey(0)
    k1, k2, k3, k4, k5, k6 = jax.random.split(key, 6)
    G = 2

    # --- case 1: tiny shapes (single tile, single chunk) ----------------------------
    router_outputs = [
        jax.random.normal(k1, (G, 8, NUM_EXPERTS), dtype=jnp.float32),
        jax.random.normal(k2, (G, 8, NUM_EXPERTS), dtype=jnp.float32),
    ]
    attention_mask = jnp.ones((G, 16), dtype=jnp.float32)   # unused, as in torch
    loss = switch_router_loss(
        router_outputs, attention_mask,
        num_experts=NUM_EXPERTS, expert_capacity=3,
        router_z_loss_coef=Z_LOSS_COEF, router_aux_loss_coef=AUX_LOSS_COEF)
    loss = jax.block_until_ready(loss)
    ref = _reference_loss(jnp.concatenate(router_outputs, axis=1),
                          NUM_EXPERTS, 3, Z_LOSS_COEF, AUX_LOSS_COEF)
    assert jnp.allclose(loss, ref, rtol=1e-5, atol=1e-6), (loss, ref)

    # --- case 2: multiple token tiles (cross-tile capacity carry + tail padding) -----
    router_outputs2 = [
        jax.random.normal(k3, (G, 72, NUM_EXPERTS), dtype=jnp.float32),
        jax.random.normal(k4, (G, 72, NUM_EXPERTS), dtype=jnp.float32),
    ]
    loss2 = switch_router_loss(
        router_outputs2, None,
        num_experts=NUM_EXPERTS, expert_capacity=16,
        router_z_loss_coef=Z_LOSS_COEF, router_aux_loss_coef=AUX_LOSS_COEF,
        token_tile=128, prefix_chunk=128)   # T=144 -> 2 token tiles, padded to 256
    loss2 = jax.block_until_ready(loss2)
    ref2 = _reference_loss(jnp.concatenate(router_outputs2, axis=1),
                           NUM_EXPERTS, 16, Z_LOSS_COEF, AUX_LOSS_COEF)
    assert jnp.allclose(loss2, ref2, rtol=1e-5, atol=1e-6), (loss2, ref2)

    # --- case 3: multiple prefix chunks inside one tile (chunk carry + padding) -------
    router_outputs3 = [
        jax.random.normal(k5, (G, 150, NUM_EXPERTS), dtype=jnp.float32),
        jax.random.normal(k6, (G, 150, NUM_EXPERTS), dtype=jnp.float32),
    ]
    loss3 = switch_router_loss(
        router_outputs3, None,
        num_experts=NUM_EXPERTS, expert_capacity=24,
        router_z_loss_coef=Z_LOSS_COEF, router_aux_loss_coef=AUX_LOSS_COEF,
        prefix_chunk=128)                   # T=300 -> one 384-token tile, 3 chunks
    loss3 = jax.block_until_ready(loss3)
    ref3 = _reference_loss(jnp.concatenate(router_outputs3, axis=1),
                           NUM_EXPERTS, 24, Z_LOSS_COEF, AUX_LOSS_COEF)
    assert jnp.allclose(loss3, ref3, rtol=1e-5, atol=1e-6), (loss3, ref3)

    print("KERNEL_OK")
</pallas_src>

<mosaic_0001>
module attributes {stable_mosaic.version = 11 : i64} {
  func.func @_router_loss_kernel(%arg0: i32, %arg1: i32, %arg2: memref<16x16xbf16, #tpu.memory_space<vmem>>, %arg3: memref<1x16x8xf32, #tpu.memory_space<vmem>>, %arg4: memref<1x1x128xf32, #tpu.memory_space<vmem>>, %arg5: memref<8x1xf32, #tpu.memory_space<vmem>>, %arg6: memref<8x1xf32, #tpu.memory_space<vmem>>, %arg7: memref<8x1xf32, #tpu.memory_space<vmem>>, %arg8: memref<1x1xf32, #tpu.memory_space<vmem>>) attributes {dimension_semantics = [#tpu.dimension_semantics<parallel>, #tpu.dimension_semantics<arbitrary>], iteration_bounds = array<i64: 2, 1>, scalar_prefetch = 0 : i64, scratch_operands = 4 : i64, tpu.core_type = #tpu.core_type<tc>, window_params = [{pipeline_mode = #tpu.pipeline_mode<synchronous>, transform_indices = @transform_0, window_bounds = array<i64: 16, 16>}, {transform_indices = @transform_1, window_bounds = array<i64: 1, 16, 8>}, {transform_indices = @transform_2, window_bounds = array<i64: 1, 1, 128>}]} {
    %c0_i32 = arith.constant 0 : i32
    %0 = arith.cmpi eq, %arg1, %c0_i32 : i32
    %1 = arith.extui %0 : i1 to i32
    %c0_i32_0 = arith.constant 0 : i32
    %2 = arith.cmpi ne, %1, %c0_i32_0 : i32
    scf.if %2 {
      %cst_38 = arith.constant 0.000000e+00 : f32
      %94 = vector.broadcast %cst_38 : f32 to vector<8x1xf32>
      %c0_39 = arith.constant 0 : index
      %c0_40 = arith.constant 0 : index
      %95 = vector.load %arg5[%c0_39, %c0_40] : memref<8x1xf32, #tpu.memory_space<vmem>>, vector<8x1xf32>
      tpu.vector_store %arg5[%c0_39, %c0_40], %94 {strides = array<i32>} : memref<8x1xf32, #tpu.memory_space<vmem>>, vector<8x1xf32>,
      %cst_41 = arith.constant 0.000000e+00 : f32
      %96 = vector.broadcast %cst_41 : f32 to vector<8x1xf32>
      %c0_42 = arith.constant 0 : index
      %c0_43 = arith.constant 0 : index
      %97 = vector.load %arg6[%c0_42, %c0_43] : memref<8x1xf32, #tpu.memory_space<vmem>>, vector<8x1xf32>
      tpu.vector_store %arg6[%c0_42, %c0_43], %96 {strides = array<i32>} : memref<8x1xf32, #tpu.memory_space<vmem>>, vector<8x1xf32>,
      %cst_44 = arith.constant 0.000000e+00 : f32
      %98 = vector.broadcast %cst_44 : f32 to vector<8x1xf32>
      %c0_45 = arith.constant 0 : index
      %c0_46 = arith.constant 0 : index
      %99 = vector.load %arg7[%c0_45, %c0_46] : memref<8x1xf32, #tpu.memory_space<vmem>>, vector<8x1xf32>
      tpu.vector_store %arg7[%c0_45, %c0_46], %98 {strides = array<i32>} : memref<8x1xf32, #tpu.memory_space<vmem>>, vector<8x1xf32>,
      %cst_47 = arith.constant 0.000000e+00 : f32
      %100 = vector.broadcast %cst_47 : f32 to vector<1x1xf32>
      %c0_48 = arith.constant 0 : index
      %c0_49 = arith.constant 0 : index
      %101 = vector.load %arg8[%c0_48, %c0_49] : memref<1x1xf32, #tpu.memory_space<vmem>>, vector<1x1xf32>
      tpu.vector_store %arg8[%c0_48, %c0_49], %100 {strides = array<i32>} : memref<1x1xf32, #tpu.memory_space<vmem>>, vector<1x1xf32>,
    } else {
    }
    %c0 = arith.constant 0 : index
    %c0_1 = arith.constant 0 : index
    %c0_2 = arith.constant 0 : index
    %3 = vector.load %arg3[%c0, %c0_1, %c0_2] : memref<1x16x8xf32, #tpu.memory_space<vmem>>, vector<1x16x8xf32>
    %4 = vector.shape_cast %3 : vector<1x16x8xf32> to vector<16x8xf32>
    %5 = tpu.iota {dimensions = array<i32: 0>} : vector<8x8xi32>
    %6 = tpu.iota {dimensions = array<i32: 1>} : vector<8x8xi32>
    %7 = arith.cmpi eq, %5, %6 : vector<8x8xi32>
    %8 = arith.extui %7 : vector<8x8xi1> to vector<8x8xi32>
    %9 = arith.sitofp %8 : vector<8x8xi32> to vector<8x8xf32>
    %10 = arith.truncf %9 : vector<8x8xf32> to vector<8x8xbf16>
    %11 = arith.truncf %4 : vector<16x8xf32> to vector<16x8xbf16>
    %12 = arith.extf %11 : vector<16x8xbf16> to vector<16x8xf32>
    %13 = arith.subf %4, %12 : vector<16x8xf32>
    %14 = arith.truncf %13 : vector<16x8xf32> to vector<16x8xbf16>
    %15 = arith.extf %14 : vector<16x8xbf16> to vector<16x8xf32>
    %16 = arith.subf %13, %15 : vector<16x8xf32>
    %17 = arith.truncf %16 : vector<16x8xf32> to vector<16x8xbf16>
    %cst = arith.constant dense<0.000000e+00> : vector<8x16xf32>
    %18 = tpu.matmul %10, %11, %cst {dimension_numbers = #tpu.dot_dimension_numbers<[1], [1], [0], [0], [0, 0, 1, 0], [], []>} : vector<8x8xbf16>, vector<16x8xbf16>, vector<8x16xf32> -> vector<8x16xf32>
    %cst_3 = arith.constant dense<0.000000e+00> : vector<8x16xf32>
    %19 = tpu.matmul %10, %14, %cst_3 {dimension_numbers = #tpu.dot_dimension_numbers<[1], [1], [0], [0], [0, 0, 1, 0], [], []>} : vector<8x8xbf16>, vector<16x8xbf16>, vector<8x16xf32> -> vector<8x16xf32>
    %20 = arith.addf %18, %19 : vector<8x16xf32>
    %cst_4 = arith.constant dense<0.000000e+00> : vector<8x16xf32>
    %21 = tpu.matmul %10, %17, %cst_4 {dimension_numbers = #tpu.dot_dimension_numbers<[1], [1], [0], [0], [0, 0, 1, 0], [], []>} : vector<8x8xbf16>, vector<16x8xbf16>, vector<8x16xf32> -> vector<8x16xf32>
    %22 = arith.addf %20, %21 : vector<8x16xf32>
    %cst_5 = arith.constant dense<0xFF800000> : vector<16xf32>
    %23 = vector.multi_reduction <maximumf>, %22, %cst_5 [0] : vector<8x16xf32> to vector<16xf32>
    %24 = vector.shape_cast %23 : vector<16xf32> to vector<1x16xf32>
    %25 = vector.broadcast %24 : vector<1x16xf32> to vector<8x16xf32>
    %26 = arith.subf %22, %25 : vector<8x16xf32>
    %27 = math.exp %26 : vector<8x16xf32>
    %cst_6 = arith.constant dense<0.000000e+00> : vector<16xf32>
    %28 = vector.multi_reduction <add>, %27, %cst_6 [0] : vector<8x16xf32> to vector<16xf32>
    %29 = vector.shape_cast %28 : vector<16xf32> to vector<1x16xf32>
    %30 = math.log %29 : vector<1x16xf32>
    %31 = arith.addf %24, %30 : vector<1x16xf32>
    %32 = arith.mulf %31, %31 : vector<1x16xf32>
    %c0_7 = arith.constant 0 : index
    %c0_8 = arith.constant 0 : index
    %33 = vector.load %arg8[%c0_7, %c0_8] : memref<1x1xf32, #tpu.memory_space<vmem>>, vector<1x1xf32>
    %34 = vector.shape_cast %32 : vector<1x16xf32> to vector<1x1x16xf32>
    %cst_9 = arith.constant dense<0.000000e+00> : vector<1xf32>
    %35 = vector.multi_reduction <add>, %34, %cst_9 [1, 2] : vector<1x1x16xf32> to vector<1xf32>
    %36 = vector.shape_cast %35 : vector<1xf32> to vector<1x1x1xf32>
    %37 = vector.extract %36[0, 0, 0] : f32 from vector<1x1x1xf32>
    %38 = vector.broadcast %37 : f32 to vector<1x1xf32>
    %39 = arith.addf %33, %38 : vector<1x1xf32>
    %c0_10 = arith.constant 0 : index
    %c0_11 = arith.constant 0 : index
    %40 = vector.load %arg8[%c0_10, %c0_11] : memref<1x1xf32, #tpu.memory_space<vmem>>, vector<1x1xf32>
    tpu.vector_store %arg8[%c0_10, %c0_11], %39 {strides = array<i32>} : memref<1x1xf32, #tpu.memory_space<vmem>>, vector<1x1xf32>,
    %cst_12 = arith.constant 1.000000e+00 : f32
    %41 = vector.broadcast %cst_12 : f32 to vector<1x16xf32>
    %42 = arith.divf %41, %29 : vector<1x16xf32>
    %43 = vector.broadcast %42 : vector<1x16xf32> to vector<8x16xf32>
    %44 = arith.mulf %27, %43 : vector<8x16xf32>
    %c0_13 = arith.constant 0 : index
    %c0_14 = arith.constant 0 : index
    %45 = vector.load %arg6[%c0_13, %c0_14] : memref<8x1xf32, #tpu.memory_space<vmem>>, vector<8x1xf32>
    %cst_15 = arith.constant dense<0.000000e+00> : vector<8xf32>
    %46 = vector.multi_reduction <add>, %44, %cst_15 [1] : vector<8x16xf32> to vector<8xf32>
    %47 = vector.shape_cast %46 : vector<8xf32> to vector<8x1xf32>
    %48 = arith.addf %45, %47 : vector<8x1xf32>
    %c0_16 = arith.constant 0 : index
    %c0_17 = arith.constant 0 : index
    %49 = vector.load %arg6[%c0_16, %c0_17] : memref<8x1xf32, #tpu.memory_space<vmem>>, vector<8x1xf32>
    tpu.vector_store %arg6[%c0_16, %c0_17], %48 {strides = array<i32>} : memref<8x1xf32, #tpu.memory_space<vmem>>, vector<8x1xf32>,
    %50 = tpu.iota {dimensions = array<i32: 0>} : vector<8x16xi32>
    %51 = arith.sitofp %50 : vector<8x16xi32> to vector<8x16xf32>
    %52 = vector.broadcast %24 : vector<1x16xf32> to vector<8x16xf32>
    %53 = arith.cmpf oeq, %22, %52 : vector<8x16xf32>
    %cst_18 = arith.constant 8.000000e+00 : f32
    %54 = vector.broadcast %cst_18 : f32 to vector<8x16xf32>
    %55 = arith.select %53, %51, %54 : vector<8x16xi1>, vector<8x16xf32>
    %cst_19 = arith.constant dense<0x7F800000> : vector<16xf32>
    %56 = vector.multi_reduction <minimumf>, %55, %cst_19 [0] : vector<8x16xf32> to vector<16xf32>
    %57 = vector.shape_cast %56 : vector<16xf32> to vector<1x16xf32>
    %58 = vector.broadcast %57 : vector<1x16xf32> to vector<8x16xf32>
    %59 = arith.cmpf oeq, %51, %58 : vector<8x16xf32>
    %60 = arith.extui %59 : vector<8x16xi1> to vector<8x16xi32>
    %61 = arith.sitofp %60 : vector<8x16xi32> to vector<8x16xf32>
    %c0_20 = arith.constant 0 : index
    %c0_21 = arith.constant 0 : index
    %62 = vector.load %arg2[%c0_20, %c0_21] : memref<16x16xbf16, #tpu.memory_space<vmem>>, vector<16x16xbf16>
    %c0_22 = arith.constant 0 : index
    %c0_23 = arith.constant 0 : index
    %63 = vector.load %arg5[%c0_22, %c0_23] : memref<8x1xf32, #tpu.memory_space<vmem>>, vector<8x1xf32>
    %cst_24 = arith.constant 0.000000e+00 : f32
    %64 = vector.broadcast %cst_24 : f32 to vector<8x1xf32>
    %65 = arith.truncf %61 : vector<8x16xf32> to vector<8x16xbf16>
    %cst_25 = arith.constant dense<0.000000e+00> : vector<8x16xf32>
    %66 = tpu.matmul %65, %62, %cst_25 {dimension_numbers = #tpu.dot_dimension_numbers<[1], [0], [0], [1], [0, 0, 1, 1], [], []>} : vector<8x16xbf16>, vector<16x16xbf16>, vector<8x16xf32> -> vector<8x16xf32>
    %67 = vector.broadcast %63 : vector<8x1xf32> to vector<8x16xf32>
    %68 = arith.addf %66, %67 : vector<8x16xf32>
    %cst_26 = arith.constant 3.000000e+00 : f32
    %69 = vector.broadcast %cst_26 : f32 to vector<8x16xf32>
    %70 = arith.cmpf ole, %68, %69 : vector<8x16xf32>
    %71 = arith.extui %70 : vector<8x16xi1> to vector<8x16xi32>
    %72 = arith.sitofp %71 : vector<8x16xi32> to vector<8x16xf32>
    %73 = arith.mulf %61, %72 : vector<8x16xf32>
    %74 = arith.mulf %51, %73 : vector<8x16xf32>
    %cst_27 = arith.constant dense<0.000000e+00> : vector<16xf32>
    %75 = vector.multi_reduction <add>, %74, %cst_27 [0] : vector<8x16xf32> to vector<16xf32>
    %76 = vector.shape_cast %75 : vector<16xf32> to vector<1x16xf32>
    %77 = vector.broadcast %76 : vector<1x16xf32> to vector<8x16xf32>
    %78 = arith.cmpf oeq, %51, %77 : vector<8x16xf32>
    %79 = arith.extui %78 : vector<8x16xi1> to vector<8x16xi32>
    %80 = arith.sitofp %79 : vector<8x16xi32> to vector<8x16xf32>
    %cst_28 = arith.constant dense<0.000000e+00> : vector<8xf32>
    %81 = vector.multi_reduction <add>, %80, %cst_28 [1] : vector<8x16xf32> to vector<8xf32>
    %82 = vector.shape_cast %81 : vector<8xf32> to vector<8x1xf32>
    %83 = arith.addf %64, %82 : vector<8x1xf32>
    %cst_29 = arith.constant dense<0.000000e+00> : vector<8xf32>
    %84 = vector.multi_reduction <add>, %61, %cst_29 [1] : vector<8x16xf32> to vector<8xf32>
    %85 = vector.shape_cast %84 : vector<8xf32> to vector<8x1xf32>
    %86 = arith.addf %63, %85 : vector<8x1xf32>
    %c0_30 = arith.constant 0 : index
    %c0_31 = arith.constant 0 : index
    %87 = vector.load %arg5[%c0_30, %c0_31] : memref<8x1xf32, #tpu.memory_space<vmem>>, vector<8x1xf32>
    tpu.vector_store %arg5[%c0_30, %c0_31], %86 {strides = array<i32>} : memref<8x1xf32, #tpu.memory_space<vmem>>, vector<8x1xf32>,
    %c0_32 = arith.constant 0 : index
    %c0_33 = arith.constant 0 : index
    %88 = vector.load %arg7[%c0_32, %c0_33] : memref<8x1xf32, #tpu.memory_space<vmem>>, vector<8x1xf32>
    %89 = arith.addf %88, %83 : vector<8x1xf32>
    %c0_34 = arith.constant 0 : index
    %c0_35 = arith.constant 0 : index
    %90 = vector.load %arg7[%c0_34, %c0_35] : memref<8x1xf32, #tpu.memory_space<vmem>>, vector<8x1xf32>
    tpu.vector_store %arg7[%c0_34, %c0_35], %89 {strides = array<i32>} : memref<8x1xf32, #tpu.memory_space<vmem>>, vector<8x1xf32>,
    %c0_i32_36 = arith.constant 0 : i32
    %91 = arith.cmpi eq, %arg1, %c0_i32_36 : i32
    %92 = arith.extui %91 : i1 to i32
    %c0_i32_37 = arith.constant 0 : i32
    %93 = arith.cmpi ne, %92, %c0_i32_37 : i32
    scf.if %93 {
      %c0_38 = arith.constant 0 : index
      %c0_39 = arith.constant 0 : index
      %94 = vector.load %arg8[%c0_38, %c0_39] : memref<1x1xf32, #tpu.memory_space<vmem>>, vector<1x1xf32>
      %c0_40 = arith.constant 0 : index
      %c0_41 = arith.constant 0 : index
      %95 = vector.load %arg7[%c0_40, %c0_41] : memref<8x1xf32, #tpu.memory_space<vmem>>, vector<8x1xf32>
      %c0_42 = arith.constant 0 : index
      %c0_43 = arith.constant 0 : index
      %96 = vector.load %arg6[%c0_42, %c0_43] : memref<8x1xf32, #tpu.memory_space<vmem>>, vector<8x1xf32>
      %97 = arith.mulf %95, %96 : vector<8x1xf32>
      %98 = vector.shape_cast %97 : vector<8x1xf32> to vector<1x8x1xf32>
      %cst_44 = arith.constant dense<0.000000e+00> : vector<1xf32>
      %99 = vector.multi_reduction <add>, %98, %cst_44 [1, 2] : vector<1x8x1xf32> to vector<1xf32>
      %100 = vector.shape_cast %99 : vector<1xf32> to vector<1x1x1xf32>
      %101 = vector.extract %100[0, 0, 0] : f32 from vector<1x1x1xf32>
      %102 = vector.broadcast %101 : f32 to vector<1x1xf32>
      %103 = tpu.iota {dimensions = array<i32: 1>} : vector<1x128xi32>
      %c0_i32_45 = arith.constant 0 : i32
      %104 = vector.broadcast %c0_i32_45 : i32 to vector<1x128xi32>
      %105 = arith.cmpi eq, %103, %104 : vector<1x128xi32>
      %106 = vector.shape_cast %94 : vector<1x1xf32> to vector<1x1xf32>
      %107 = vector.broadcast %106 : vector<1x1xf32> to vector<1x128xf32>
      %c1_i32 = arith.constant 1 : i32
      %108 = vector.broadcast %c1_i32 : i32 to vector<1x128xi32>
      %109 = arith.cmpi eq, %103, %108 : vector<1x128xi32>
      %110 = vector.shape_cast %102 : vector<1x1xf32> to vector<1x1xf32>
      %111 = vector.broadcast %110 : vector<1x1xf32> to vector<1x128xf32>
      %cst_46 = arith.constant 0.000000e+00 : f32
      %112 = vector.broadcast %cst_46 : f32 to vector<1x128xf32>
      %113 = arith.select %109, %111, %112 : vector<1x128xi1>, vector<1x128xf32>
      %114 = arith.select %105, %107, %113 : vector<1x128xi1>, vector<1x128xf32>
      %c0_47 = arith.constant 0 : index
      %c0_48 = arith.constant 0 : index
      %c0_49 = arith.constant 0 : index
      %115 = vector.load %arg4[%c0_47, %c0_48, %c0_49] : memref<1x1x128xf32, #tpu.memory_space<vmem>>, vector<1x1x128xf32>
      %116 = vector.shape_cast %115 : vector<1x1x128xf32> to vector<1x128xf32>
      %117 = vector.shape_cast %114 : vector<1x128xf32> to vector<1x1x128xf32>
      tpu.vector_store %arg4[%c0_47, %c0_48, %c0_49], %117 {strides = array<i32>} : memref<1x1x128xf32, #tpu.memory_space<vmem>>, vector<1x1x128xf32>,
    } else {
    }
    return
  }
  func.func @transform_0(%arg0: i32, %arg1: i32) -> (i32, i32) {
    %c0_i32 = arith.constant 0 : i32
    %c0_i32_0 = arith.constant 0 : i32
    %c0_i32_1 = arith.constant 0 : i32
    return %c0_i32, %c0_i32_0 : i32, i32
  }
  func.func @transform_1(%arg0: i32, %arg1: i32) -> (i32, i32, i32) {
    %c0_i32 = arith.constant 0 : i32
    %c0_i32_0 = arith.constant 0 : i32
    return %arg0, %arg1, %c0_i32 : i32, i32, i32
  }
  func.func @transform_2(%arg0: i32, %arg1: i32) -> (i32, i32, i32) {
    %c0_i32 = arith.constant 0 : i32
    %c0_i32_0 = arith.constant 0 : i32
    %c0_i32_1 = arith.constant 0 : i32
    return %arg0, %c0_i32, %c0_i32_0 : i32, i32, i32
  }
}

</mosaic_0001>

<bundles_post_ra>
// kernel: tpu_custom_call.1
= control target key start
LH: loop header
LB: loop body
LE: loop exit
PB: predicated region body
PF: predicated region fallthrough
CT: control target
= control target key end

     0   :  { %7 = vsyncpa [#allocation7], 0  ;;  %s844_s0 = inlined_call_operand.vmem [shape: bf16[16,16], index: 0, kind: input, shape index: {}]   ;;  %s845_s1 = inlined_call_operand.vmem [shape: f32[2,16,8], index: 1, kind: input, shape index: {}]   ;;  %s846_s2 = inlined_call_operand.hbm [shape: f32[2,1,128], index: 2, kind: output, shape index: {}]  }
   0x1   :  { %9 = vsyncpa [#allocation7 + $0x1], 0  ;;  %s698_s9 = smov 0   ;;  %s700_s10 = smov 0  }
   0x2   :  { %s702_s11 = smov 0   ;;  %s704_s12 = smov 0  }
   0x3   :  { %s706_s13 = smov 0   ;;  %s708_s14 = smov 0  }
   0x4 LB: > { %s509_s15 = sadd.s32 4294967295, %s679_s14   ;;  %s510_s16 = sadd.s32 4294967294, %s679_s14   ;;  %s679_s14 = sphi %s708_s14, %s15_s14   ;;  %s675_s13 = sphi %s706_s13, %s853_s13   ;;  %s671_s12 = sphi %s704_s12, %s852_s12   ;;  %s667_s11 = sphi %s702_s11, %s851_s11   ;;  %s663_s10 = sphi %s700_s10, %s850_s10   ;;  %s659_s9 = sphi %s698_s9, %s849_s9  }
   0x5   : > { %s27_s17 = sadd.s32 1, %s675_s13  ;;  %s83_s18 = sadd.s32 1, %s667_s11 }
   0x6   : > { %p29_p0 = scmp.ge.s32.totalorder %s27_s17, 2  ;;  %p93_p1 = scmp.ne.s32.totalorder %s667_s11, %s663_s10 }
   0x7   : > { %p94_p2 = scmp.eq.s32.totalorder %s509_s15, 1  ;;  %p99_p3 = scmp.ne.s32.totalorder %s663_s10, %s659_s9 }
   0x8   : > { %s855_s17 = smov (%p29_p0, %s27_s17), 0  ;;  %p100_p5 = scmp.eq.s32.totalorder %s510_s16, 1 }
   0x9   : > { %p738_p4 = por %p94_p2, %p93_p1  ;;  %s80_s20 = ssub.s32 %s675_s13, %s855_s17 }
   0xa   : > { %p513_p6 = scmp.ge.s32.totalorder %s679_s14, 1  ;;  %p81_p7 = scmp.eq.s32.totalorder %s80_s20, 0 }
   0xb   : > { %p745_p8 = por %p100_p5, %p99_p3  ;;  %p134_p9 = scmp.lt.s32.totalorder %s679_s14, 3 }
   0xc   : > { %s751_s22 = scalar_select %p81_p7, %s667_s11, %s83_s18  }
   0xd   : > { %p135_p10 = pnand %p513_p6, %p134_p9 }
   0xe   : > { %p160_p11 = scmp.lt.s32.totalorder (!%p135_p10), %s671_s12, 1  ;;  %s157_s3 = sand.u32 (!%p135_p10), 1, %s663_s10  }
   0xf   : > { %138 = sbr.rel (%p135_p10) target bundleno = 682 (0x2aa), region = 28  ;;  %s436_s6 = scalar_lea.hbm (!%p135_p10), %s846_s2, %s671_s12 }
  0x10   : > { %s158_s7 = scalar_lea.vmem (!%p135_p10), [#allocation6], %s157_s3  ;;  %s440_s15 = sshll.u32 (!%p135_p10), %s436_s6, 4  ;;  %s441_s15 = int_to_ptr.hbm [resolvable:$true] %s440_s15 }
  0x11   : > { %s438_s8 = sshll.u32 (!%p135_p10), %s158_s7, 4  ;;  %s428_s18 = scalar_lea.sflag (!%p135_p10), [#allocation7], %s157_s3  ;;  %s439_s8 = int_to_ptr.vmem [resolvable:$true] %s438_s8 }
  0x12   : > { %s615_s20 = sshra.s32 (!%p135_p10), %s441_s15, 4  ;;  %s621_s25 = scalar_lea.hbm (!%p135_p10), %s846_s2, 2  ;;  %s616_s20 = int_to_ptr.hbm [resolvable:$true] %s615_s20 }
  0x13   : > { %p622_p1 = scmp.lt.s32.totalorder (!%p135_p10), %s616_s20, %s846_s2 }
  0x14   : > { %s161_s23 = scalar_select %p160_p11, %s671_s12, 1  ;;  %v182_v0 = vlaneseq  ;;  %vm208_vm0 = vcmask 64512   ;;  %v681_v17 = vmov 0.0   ;;  %vm174_vm2 = vcmask 7168   ;;  %v531_v36 = vld [vmem:[%s844_s0] sm:$0xff] }
  0x15   : > { %175 = vst.msk [vmem:[#allocation2] sm:$0xff] %vm174_vm2, %v681_v17  ;;  %v682_v30 = vmov 0   ;;  %vm266_vm3 = vcmask 130048   ;;  %365 = vmatpush.bf16.msra.mxu3 %v531_v36  ;;  %vm289_vm12 = vcmask 122880   ;;  %vm178_vm13 = vcmask 0   ;;  %s617_s12 = scalar_lea.hbm %s616_s20, 1 }
  0x16   : > { %s530_s24 = sshll.u32 %s161_s23, 4  ;;  %v183_v5 = vshrl.u32 %v182_v0, 7  ;;  %v758_v6 = vand.u32 127, %v182_v0  ;;  %176 = vst.msk [vmem:[#allocation3] sm:$0xff] %vm174_vm2, %v681_v17  ;;  %593 = vset.pattern.permute.xlu0 %v682_v30  ;;  %594 = vset.pattern.permute.xlu2 %v682_v30  ;;  %p618_p12 = scmp.ne.s32.totalorder %s616_s20, %s617_s12 }
  0x17   : > { %s167_s27 = scalar_lea.vmem %s845_s1, %s530_s24  ;;  %177 = vst.msk [vmem:[#allocation4] sm:$0xff] %vm174_vm2, %v681_v17  ;;  %p623_p2 = scmp.lt.s32.totalorder %s621_s25, %s617_s12 }
  0x18   : > { %v180_v1 = vld [vmem:[%s167_s27] sm:$0xff]  ;;  %v181_v2 = vld [vmem:[%s167_s27 + $0x8] sm:$0xff]  ;;  %vm186_vm1 = vcmp.eq.s32.totalorder %v183_v5, %v758_v6  ;;  %v781_v47 = vcvt.s32.f32 %v183_v5  ;;  %179 = vst.msk [vmem:[#allocation5] sm:$0x1] %vm178_vm13, %v681_v17  ;;  %vm422_vm14 = vcmp.eq.s32.totalorder %v758_v6, 1  ;;  %vm415_vm15 = vcmp.eq.s32.totalorder %v758_v6, 0  ;;  %p619_p13 = pnand %p618_p12, %p738_p4 }
  0x19   : > { %v190_v3 = vpack.c.bf16 %v180_v1, %v180_v1  ;;  %v191_v4 = vpack.c.bf16 %v181_v2, %v181_v2  ;;  %v516_v18 = vsel %vm186_vm1, 1.0, %v681_v17  ;;  %p624_p3 = por %p623_p2, %p622_p1 }
  0x1a   : > { %v189_v26 = vpack.c.bf16 %v516_v18, %v516_v18  ;;  %p620_p0 = pneg %p619_p13 }
  0x1b   : > { %v192_v7 = vunpack.c.l.bf16 %v190_v3  ;;  %v193_v8 = vunpack.c.l.bf16 %v191_v4  ;;  %v230_v9 = vunpack.c.l.b16 %v190_v3  ;;  %v231_v10 = vunpack.c.l.b16 %v191_v4 }
  0x1c   : > { %v774_v31 = vld [vmem:[#allocation2] sm:$0xff]  ;;  %p625_p5 = pnand %p624_p3, %p620_p0 }
  0x1d   : > { %v232_v11 = vpack.c.b16 %v231_v10, %v230_v9  ;;  %v194_v12 = vsub.f32 %v180_v1, %v192_v7  ;;  %v195_v13 = vsub.f32 %v181_v2, %v193_v8  ;;  %346 = vperm.xlu0 %593, %v774_v31  }
  0x1f   : > { %v234_v14 = vsel %vm208_vm0, %v232_v11, 0  ;;  %v196_v15 = vpack.c.bf16 %v194_v12, %v194_v12  ;;  %v197_v16 = vpack.c.bf16 %v195_v13, %v195_v13 }
  0x20   : > { %243 = vmatpush.bf16.xpose.msra.mxu1 %v234_v14 }
  0x21   : > { %v205_v19 = vunpack.c.l.b16 %v196_v15  ;;  %v206_v20 = vunpack.c.l.b16 %v197_v16  ;;  %v198_v21 = vunpack.c.l.bf16 %v196_v15  ;;  %v199_v22 = vunpack.c.l.bf16 %v197_v16 }
  0x23   : > { %v207_v23 = vpack.c.b16 %v206_v20, %v205_v19  ;;  %v200_v24 = vsub.f32 %v194_v12, %v198_v21  ;;  %v201_v25 = vsub.f32 %v195_v13, %v199_v22 }
  0x25   : > { %v213_v27 = vsel %vm208_vm0, %v207_v23, 0  ;;  %v202_v28 = vpack.c.bf16 %v201_v25, %v200_v24 }
  0x26   : > { %222 = vmatpush.bf16.xpose.msra.mxu0 %v213_v27 }
  0x27   : > { %v250_v29 = vsel %vm208_vm0, %v202_v28, 0  ;;  %518 = vmatmul.msk.bf16.vlgmr.msra.gmra.mxu1 %vm208_vm0, %v189_v26  ;;  %v320_v28 = vld [vmem:[#allocation3] sm:$0xff] }
  0x28   : > { %259 = vmatpush.bf16.xpose.msra.mxu2 %v250_v29 }
  0x2d   : > { %517 = vmatmul.msk.bf16.vlgmr.msra.gmra.mxu0 %vm208_vm0, %v189_v26 }
  0x2f   : > { %519 = vmatmul.msk.bf16.vlgmr.msra.gmra.mxu2 %vm208_vm0, %v189_v26 }
  0x8f   : > { %v347_v22 = vpop.permute.xlu0 %346 }
  0xa4   : > { %v245_v32 = vpop.f32.mrf.mxu1 }
  0xaa   : > { %v224_v33 = vpop.f32.mrf.mxu0 }
  0xab   : > { %v246_v35 = vadd.f32 %v245_v32, %v224_v33 }
  0xac   : > { %v247_v34 = vpop.f32.mrf.mxu1 }
  0xb2   : > { %v226_v37 = vpop.f32.mrf.mxu0  ;;  %v261_v38 = vpop.f32.mrf.mxu2 }
  0xb3   : > { %v265_v39 = vadd.f32 %v261_v38, %v246_v35 }
  0xb5   : > { %v267_v40 = vsel %vm266_vm3, %v265_v39, -inf }
  0xb6   : > { %v268_v41 = vrot.slane %v267_v40, 4 }
  0xb8   : > { %v269_v42 = vmax.f32 %v267_v40, %v268_v41 }
  0xba   : > { %v270_v43 = vrot.slane %v269_v42, 2  ;;  %v263_v44 = vpop.f32.mrf.mxu2 }
  0xbc   : > { %v271_v45 = vmax.f32 %v269_v42, %v270_v43 }
  0xbe   : > { %v272_v46 = vrot.slane %v271_v45, 1 }
  0xc0   : > { %v273_v48 = vmax.f32 %v271_v45, %v272_v46  ;;  %v395_v45 = vld [vmem:[#allocation4] sm:$0xff] }
  0xc2   : > { %v274_v49 = vsub.f32 %v265_v39, %v273_v48  ;;  %vm328_vm4 = vcmp.eq.f32.partialorder %v265_v39, %v273_v48 }
  0xc3   : > { %v329_v50 = vsel %vm328_vm4, %v781_v47, 8.0 }
  0xc4   : > { %v275_v51 = vmul.f32 1.442695, %v274_v49  ;;  %v330_v52 = vsel %vm266_vm3, %v329_v50, inf }
  0xc5   : > { %v331_v53 = vrot.slane %v330_v52, 4 }
  0xc6   : > { %595 = vpow2.f32 %v275_v51 }
  0xc7   : > { %v332_v54 = vmin.f32 %v330_v52, %v331_v53 }
  0xc9   : > { %v333_v55 = vrot.slane %v332_v54, 2 }
  0xcb   : > { %v334_v56 = vmin.f32 %v332_v54, %v333_v55 }
  0xcc   : > { %v596_v57 = vpop.eup %595 }
  0xcd   : > { %v277_v58 = vsel %vm266_vm3, %v596_v57, 0.0  ;;  %v335_v59 = vrot.slane %v334_v56, 1 }
  0xce   : > { %v278_v60 = vrot.slane %v277_v58, 4 }
  0xcf   : > { %v336_v61 = vmin.f32 %v334_v56, %v335_v59 }
  0xd0   : > { %v279_v62 = vadd.f32 %v278_v60, %v277_v58  ;;  %v288_v60 = vld [vmem:[#allocation5] sm:$0x1] }
  0xd1   : > { %vm337_vm5 = vcmp.eq.f32.partialorder %v781_v47, %v336_v61 }
  0xd2   : > { %v280_v63 = vrot.slane %v279_v62, 2  ;;  %v520_v0 = vsel %vm337_vm5, 1.0, %v681_v17 }
  0xd3   : > { %v343_v1 = vpack.c.bf16 %v520_v0, %v520_v0  ;;  %v390_v44 = vsel %vm266_vm3, %v520_v0, 0.0 }
  0xd4   : > { %v281_v2 = vadd.f32 %v280_v63, %v279_v62 }
  0xd5   : > { %525 = vmatmul.msk.bf16.vlgmr.msra.gmra.mxu3 %vm266_vm3, %v343_v1 }
  0xd6   : > { %v282_v3 = vrot.slane %v281_v2, 1 }
  0xd8   : > { %v283_v4 = vadd.f32 %v282_v3, %v281_v2 }
  0xda   : > { %597 = vrcp.f32 %v283_v4  ;;  %v315_v11 = vand.u32 2147483648, %v283_v4  ;;  %v313_v14 = vand.u32 2147483647, %v283_v4  ;;  %vm309_vm7 = vweird.f32 %v283_v4 }
  0xdb   : > { %599 = vlog2.f32 %v283_v4 }
  0xdc   : > { %v316_v16 = vor.u32 1.1754944e-38, %v315_v11  ;;  %vm314_vm9 = vcmp.eq.f32.partialorder %v313_v14, 8.507059e+37 }
  0xe0   : > { %v598_v5 = vpop.eup %597 }
  0xe1   : > { %v600_v7 = vpop.eup %599  ;;  %v305_v8 = vmul.f32 %v598_v5, %v283_v4  ;;  %vm310_vm6 = vweird.f32 %v598_v5 }
  0xe2   : > { %v285_v9 = vmul.f32 0.6931472, %v600_v7  ;;  %vm311_vm8 = vmor %vm309_vm7, %vm310_vm6 }
  0xe3   : > { %v306_v10 = vsub.f32 1.0, %v305_v8 }
  0xe4   : > { %v286_v12 = vadd.f32 %v285_v9, %v273_v48 }
  0xe5   : > { %v307_v13 = vmul.f32 %v598_v5, %v306_v10 }
  0xe6   : > { %v287_v42 = vmul.f32 %v286_v12, %v286_v12 }
  0xe7   : > { %v308_v15 = vadd.f32 %v598_v5, %v307_v13 }
  0xe8   : > { %v290_v43 = vsel %vm289_vm12, %v287_v42, 0.0 }
  0xe9   : > { %v312_v18 = vsel %vm311_vm8, %v598_v5, %v308_v15 }
  0xea   : > { %v317_v19 = vsel %vm314_vm9, %v316_v16, %v312_v18 }
  0xeb   : > { %v319_v20 = vmul.f32 %v596_v57, %v317_v19 }
  0xed   : > { %v321_v21 = vsel %vm266_vm3, %v319_v20, 0.0 }
  0xee   : > { %322 = vadd.xlane.f32.xlu0 %v321_v21 }
 0x158   : > { %v367_v23 = vpop.f32.mrf.mxu3 }
 0x159   : > { %v368_v24 = vadd.f32 %v367_v23, %v347_v22 }
 0x15b   : > { %vm371_vm10 = vcmp.le.f32.partialorder %v368_v24, 3.0 }
 0x15c   : > { %v526_v25 = vsel %vm371_vm10, 1.0, %v681_v17 }
 0x15d   : > { %v374_v26 = vmul.f32 %v526_v25, %v520_v0 }
 0x15f   : > { %v375_v27 = vmul.f32 %v374_v26, %v781_v47 }
 0x160   : > { %v369_v29 = vpop.f32.mrf.mxu3 }
 0x161   : > { %v376_v30 = vsel %vm266_vm3, %v375_v27, 0.0  ;;  %v323_v32 = vpop.xlane.xlu0 %322 }
 0x162   : > { %v377_v33 = vrot.slane %v376_v30, 4  ;;  %v324_v34 = vadd.f32 %v323_v32, %v320_v28 }
 0x164   : > { %326 = vst.msk [vmem:[#allocation3] sm:$0xff] %vm174_vm2, %v324_v34  ;;  %v378_v35 = vadd.f32 %v377_v33, %v376_v30 }
 0x166   : > { %v379_v36 = vrot.slane %v378_v35, 2 }
 0x168   : > { %v380_v37 = vadd.f32 %v379_v36, %v378_v35 }
 0x16a   : > { %v381_v38 = vrot.slane %v380_v37, 1 }
 0x16b   : > { %v403_v51 = vld [vmem:[#allocation3] sm:$0xff] }
 0x16c   : > { %v382_v39 = vadd.f32 %v381_v38, %v380_v37 }
 0x16e   : > { %vm383_vm11 = vcmp.eq.f32.partialorder %v781_v47, %v382_v39 }
 0x16f   : > { %v527_v40 = vsel %vm383_vm11, 1.0, %v681_v17 }
 0x170   : > { %v386_v41 = vsel %vm266_vm3, %v527_v40, 0.0 }
 0x171   : > { %387 = vadd.xlane.f32.xlu1 %v386_v41 }
 0x179   : > { %291 = vadd.xlane.f32.xlu1 %v290_v43 }
 0x181   : > { %391 = vadd.xlane.f32.xlu1 %v390_v44 }
 0x1e4   : > { %v388_v46 = vpop.xlane.xlu1 %387 }
 0x1e5   : > { %v396_v48 = vadd.f32 %v395_v45, %v388_v46 }
 0x1e7   : > { %397 = vst.msk [vmem:[#allocation4] sm:$0xff] %vm174_vm2, %v396_v48 }
 0x1ec   : > { %v292_v47 = vpop.xlane.xlu1 %291 }
 0x1ed   : > { %v293_v49 = vrot.slane %v292_v47, 4 }
 0x1ee   : > { %v402_v50 = vld [vmem:[#allocation4] sm:$0xff] }
 0x1ef   : > { %v294_v52 = vadd.f32 %v293_v49, %v292_v47  ;;  %v404_v53 = vmul.f32 %v403_v51, %v402_v50 }
 0x1f1   : > { %v295_v54 = vrot.slane %v294_v52, 2  ;;  %v405_v55 = vsel %vm174_vm2, %v404_v53, 0.0 }
 0x1f2   : > { %406 = vadd.xlane.f32.xlu2 %v405_v55 }
 0x1f3   : > { %v296_v56 = vadd.f32 %v295_v54, %v294_v52 }
 0x1f4   : > { %v392_v57 = vpop.xlane.xlu1 %391 }
 0x1f5   : > { %v393_v58 = vadd.f32 %v392_v57, %v774_v31  ;;  %v297_v17 = vrot.slane %v296_v56, 1 }
 0x1f7   : > { %394 = vst.msk [vmem:[#allocation2] sm:$0xff] %vm174_vm2, %v393_v58  ;;  %v298_v59 = vadd.f32 %v297_v17, %v296_v56 }
 0x1f9   : > { %532 = vpush %v298_v59 }
 0x22a   : > { %s533_s30 = spop %532 }
 0x22b   : > { %v300_v61 = vstv %s533_s30 }
 0x22c   : > { %v301_v62 = vadd.f32 %v300_v61, %v288_v60 }
 0x22e   : > { %303 = vst.msk [vmem:[#allocation5] sm:$0x1] %vm178_vm13, %v301_v62 }
 0x235   : > { %v401_v63 = vld [vmem:[#allocation5] sm:$0x1] }
 0x236   : > { %418 = vperm.xlu2 %594, %v401_v63  }
 0x265   : > { %v407_v0 = vpop.xlane.xlu2 %406 }
 0x266   : > { %v408_v1 = vrot.slane %v407_v0, 4 }
 0x268   : > { %v409_v2 = vadd.f32 %v408_v1, %v407_v0 }
 0x26a   : > { %v410_v3 = vrot.slane %v409_v2, 2 }
 0x26c   : > { %v411_v31 = vadd.f32 %v410_v3, %v409_v2 }
 0x26e   : > { %v412_v4 = vrot.slane %v411_v31, 1 }
 0x270   : > { %v413_v5 = vadd.f32 %v412_v4, %v411_v31 }
 0x272   : > { %534 = vpush %v413_v5 }
 0x290   : > { %v419_v7 = vpop.permute.xlu2 %418 }
 0x291   : > { %v421_v8 = vperm.slane %v419_v7, 0 }
 0x2a3   : > { %s535_s16 = spop %534 }
 0x2a4   : > { %v423_v9 = vstv %s535_s16 }
 0x2a5   : > { %v424_v10 = vsel %vm422_vm14, %v423_v9, 0.0 }
 0x2a6   : > { %v425_v11 = vsel %vm415_vm15, %v421_v8, %v424_v10 }
 0x2a7   : > { %426 = vst [vmem:[%s158_s7] sm:$0x1] %v425_v11 }
 0x2a8   : > { %628 = shalt.err (!%p625_p5)
}
 0x2a9   : > { %536 = dma.vmem_to_hbm [thread:$0]  (%p738_p4), %s439_s8, 16, %s441_s15, %s428_s18  }
 0x2aa PF: > { %p542_p6 = scmp.ge.s32.totalorder %s679_s14, 2  ;;  %s452_s28 = sand.u32 1, %s659_s9  }
 0x2ab   : > { %s453_s29 = scalar_lea.sflag [#allocation7], %s452_s28 }
 0x2ac   : > { %p539_p7 = pnand %p542_p6, %p745_p8 }
 0x2ae   : > { %p540_p9 = pneg %p539_p7 }
 0x2b0   : > { %654 = dma.done.wait (%p540_p9), %s453_s29, 16  }
 0x2b1   : > { %656 = vsyncadd (%p540_p9), %s453_s29, 4294967280  ;;  %s15_s14 = sadd.s32 1, %s679_s14   ;;  %s849_s9 = smov %s663_s10 }
 0x2b2   : > { %p12_p10 = scmp.ge.s32.totalorder %s15_s14, 4   ;;  %s850_s10 = smov %s667_s11 }
 0x2b3   : > { %s851_s11 = smov %s751_s22  ;;  %s852_s12 = smov %s675_s13 }
 0x2b4   : > { %s853_s13 = smov %s855_s17  ;;  %14 = sbr.rel (!%p12_p10) target bundleno = 4 (0x4), region = 71 }
 0x2b9   :  { %458 = vsyncpa [#allocation7], 1 }
 0x2ba   :  { %460 = vsyncpa [#allocation7 + $0x1], 1 }

</bundles_post_ra>
